<compile_context>
chip_gen: v7x
topology: tpu7x:2x2x1
jax: 0.10.0
libtpu: 0.0.40
codegen_flags: <defaults>
</compile_context>

<pallas_src>
import numpy as np
import jax
import jax.numpy as jnp
from jax.experimental import pallas as pl
from jax.experimental.pallas import tpu as pltpu

# ------------------------- configuration ------------------------------------
NUM_TIMESTEPS = 256          # n_sample_steps
P_FLIP = True
FOCAL_GAMMA = 1.0            # self.focal (== 1.0 -> pow specialised away)
ALPHA = -1                   # self.alpha
AUX = 0.0                    # self.aux (aux path disabled)

B = 16                       # batch (single grid step: whole batch per call)
D = 256                      # binary-latent dimension (denoise_fn.in_dim)
H = 128                      # denoiser hidden width
C = 128                      # conditioning width


# ------------------------- noise scheduler (linear) -------------------------
def make_linear_scheduler(steps):
    beta = 1.0 - 1.0 / (steps - np.arange(1, steps + 1) + 1)
    k = [1.0]
    b = [0.0]
    for i in range(steps):
        k.append(k[-1] * beta[i])
        b.append(beta[i] * b[-1] + 0.5 * (1.0 - beta[i]))
    k_final = np.hstack([1.0, np.array(k[1:])]).astype(np.float32)   # (steps+1,)
    b_final = np.hstack([0.0, np.array(b[1:])]).astype(np.float32)   # (steps+1,)
    return jnp.asarray(k_final), jnp.asarray(b_final)


# ------------------------- Pallas kernel -------------------------------------
def _binary_diffusion_loss_kernel(
    xc_ref,        # (B, D+C) bf16  : [x_t_in | cond]
    x0_ref,        # (B, D)   f32   : binary ground truth
    bias1_ref,     # (B, H)   f32   : time_emb[t-1] + b1
    w1c_ref,       # (D+C, H) bf16  : [W1; Wc] fused first-layer weight
    w2_ref,        # (H, D)   bf16
    b2_ref,        # (1, D)   f32
    kl_ref,        # (B, D)   f32 out : focal kl loss (per element)
    correct_ref,   # (B, D)   f32 out : prediction-correct mask
):
    xc = xc_ref[...]                                   # bf16
    x_t = xc[:, :D].astype(jnp.float32)                # exact: values are {0,1}
    x0 = x0_ref[...]

    # ---- denoiser MLP (single fused first-layer matmul, bf16 MXU feeds) ----
    h = jnp.dot(xc, w1c_ref[...], preferred_element_type=jnp.float32)
    h = jnp.maximum(h + bias1_ref[...], 0.0)                          # ReLU
    logits = jnp.dot(h.astype(jnp.bfloat16), w2_ref[...],
                     preferred_element_type=jnp.float32) + b2_ref[...]

    # ---- p_flip target: xor(x_0, x_t_in) as {0,1} float ----
    tgt = x0 * (1.0 - x_t) + (1.0 - x0) * x_t

    # ---- focal_loss(logits, tgt, alpha=-1, gamma=1.0), f32 elementwise ----
    # Shared exponential: e = exp(-|logits|) drives both BCE and sigmoid.
    e = jnp.exp(-jnp.abs(logits))
    ce = jnp.maximum(logits, 0.0) - logits * tgt + jnp.log1p(e)       # stable BCE
    inv_1pe = pl.reciprocal(1.0 + e, approx=True)
    p = jnp.where(logits >= 0.0, inv_1pe, e * inv_1pe)                # sigmoid
    p_t = 1.0 - (p * tgt + (1.0 - p) * (1.0 - tgt))
    p_t = jnp.clip(p_t, 1e-6, 1.0 - 1e-6)
    loss = ce * p_t                                   # gamma == 1.0 -> no pow
    # alpha == -1 branch: per-row class-balance weighting
    neg_w = jnp.sum(tgt, axis=-1, keepdims=True) * (1.0 / D)          # (B, 1)
    alpha_t = (1.0 - neg_w) * tgt + neg_w * (1.0 - tgt) + 1.0 / D
    kl_ref[...] = alpha_t * loss                                      # (B, D)

    # ---- flip logits back into x_0 space (p_flip) and accuracy mask ----
    flipped = x_t * (-logits) + (1.0 - x_t) * logits
    pred = (flipped > 0.0).astype(jnp.float32)
    correct_ref[...] = (pred == x0).astype(jnp.float32)


def _pallas_loss(xc, x0, bias1, w1c, w2, b2):
    return pl.pallas_call(
        _binary_diffusion_loss_kernel,
        out_shape=(
            jax.ShapeDtypeStruct((B, D), jnp.float32),   # kl_loss_all
            jax.ShapeDtypeStruct((B, D), jnp.float32),   # correct mask
        ),
        grid_spec=pltpu.PrefetchScalarGridSpec(
            num_scalar_prefetch=0,
            grid=(1,),                                   # single step: all-VMEM
            in_specs=[
                pl.BlockSpec((B, D + C), lambda i: (0, 0)),   # [x_t_in | cond]
                pl.BlockSpec((B, D), lambda i: (0, 0)),       # x_0
                pl.BlockSpec((B, H), lambda i: (0, 0)),       # temb + b1
                pl.BlockSpec((D + C, H), lambda i: (0, 0)),   # [W1; Wc]
                pl.BlockSpec((H, D), lambda i: (0, 0)),       # W2
                pl.BlockSpec((1, D), lambda i: (0, 0)),       # b2
            ],
            out_specs=(
                pl.BlockSpec((B, D), lambda i: (0, 0)),
                pl.BlockSpec((B, D), lambda i: (0, 0)),
            ),
        ),
        compiler_params=pltpu.CompilerParams(
            dimension_semantics=("parallel",)),
    )(xc, x0, bias1, w1c, w2, b2)


# ------------------------- BinaryDiffusion forward (train loss) --------------
@jax.jit
def binary_diffusion_forward(params, x0, cond, key):
    """Mirrors BinaryDiffusion._train_loss for the chosen config."""
    x0 = x0.astype(jnp.float32) * 1.0
    key_t, key_b = jax.random.split(key)

    # sample_time: t ~ randint[1, T]
    t = jax.random.randint(key_t, (B,), 1, NUM_TIMESTEPS + 1)

    # q_sample: x_t = k_final[t] * x_0 + b_final[t]
    k = params["k_final"][t][:, None]
    b = params["b_final"][t][:, None]
    x_t = k * x0 + b
    x_t_in = jax.random.bernoulli(key_b, x_t).astype(jnp.float32)

    # time embedding gather for (t - 1), folded with b1 into one bias tensor
    bias1 = params["time_emb"][t - 1] + params["b1"]          # (B, H)

    # fused first-layer activation, bf16 MXU feed (x_t_in is {0,1}: lossless)
    xc = jnp.concatenate([x_t_in, cond], axis=-1).astype(jnp.bfloat16)

    kl_all, correct = _pallas_loss(
        xc, x0, bias1, params["w1c"], params["w2"], params["b2"])

    # TODO(synk): torch.isinf(...) -> pdb.set_trace() debug hook has no Pallas equivalent; omitted.
    n = float(B * D)
    weight = 1.0                                 # loss_final == 'mean'
    loss = jnp.sum(kl_all) / n                   # (weight * kl_loss).mean()
    kl_mean = loss                               # kl_loss.mean()
    acc = jnp.sum(correct) / n

    stats = {
        "loss": loss,
        "bce_loss": kl_mean,
        "loss_all": weight * kl_all,
        "bce_loss_all": kl_all,
        "acc": acc,
    }
    return stats


# ------------------------- parameter construction ----------------------------
def make_params():
    k_final, b_final = make_linear_scheduler(NUM_TIMESTEPS)
    kp = jax.random.PRNGKey(42)
    k1, k2, k3, k4 = jax.random.split(kp, 4)
    w1 = jax.random.normal(k1, (D, H), jnp.float32) / np.sqrt(D)
    wc = jax.random.normal(k2, (C, H), jnp.float32) / np.sqrt(C)
    params = {
        "k_final": k_final,
        "b_final": b_final,
        # fused + pre-cast once (static weights): [W1; Wc] as one bf16 matrix
        "w1c": jnp.concatenate([w1, wc], axis=0).astype(jnp.bfloat16),
        "b1": jnp.zeros((1, H), jnp.float32),
        "w2": (jax.random.normal(k3, (H, D), jnp.float32)
               / np.sqrt(H)).astype(jnp.bfloat16),
        "b2": jnp.zeros((1, D), jnp.float32),
        "time_emb": 0.02 * jax.random.normal(k4, (NUM_TIMESTEPS, H), jnp.float32),
    }
    return params


if __name__ == "__main__":
    params = make_params()
    key = jax.random.PRNGKey(0)
    kx, kc, kfwd = jax.random.split(key, 3)

    # binary latent codes and conditioning
    x0 = jax.random.bernoulli(kx, 0.5, (B, D)).astype(jnp.float32)
    cond = jax.random.normal(kc, (B, C), jnp.float32)

    stats = binary_diffusion_forward(params, x0, cond, kfwd)
    stats = jax.tree_util.tree_map(jax.block_until_ready, stats)

    assert stats["loss_all"].shape == (B, D)
    assert stats["bce_loss_all"].shape == (B, D)
    assert np.isfinite(float(stats["loss"]))
    assert np.isfinite(float(stats["bce_loss"]))
    assert 0.0 <= float(stats["acc"]) <= 1.0
    print("KERNEL_OK")
</pallas_src>

<mosaic_0001>
module attributes {stable_mosaic.version = 11 : i64} {
  func.func @_binary_diffusion_loss_kernel(%arg0: i32, %arg1: memref<16x384xbf16, #tpu.memory_space<vmem>>, %arg2: memref<16x256xf32, #tpu.memory_space<vmem>>, %arg3: memref<16x128xf32, #tpu.memory_space<vmem>>, %arg4: memref<384x128xbf16, #tpu.memory_space<vmem>>, %arg5: memref<128x256xbf16, #tpu.memory_space<vmem>>, %arg6: memref<1x256xf32, #tpu.memory_space<vmem>>, %arg7: memref<16x256xf32, #tpu.memory_space<vmem>>, %arg8: memref<16x256xf32, #tpu.memory_space<vmem>>) attributes {dimension_semantics = [#tpu.dimension_semantics<parallel>], iteration_bounds = array<i64: 1>, scalar_prefetch = 0 : i64, scratch_operands = 0 : i64, tpu.core_type = #tpu.core_type<tc>, window_params = [{pipeline_mode = #tpu.pipeline_mode<synchronous>, transform_indices = @transform_0, window_bounds = array<i64: 16, 384>}, {pipeline_mode = #tpu.pipeline_mode<synchronous>, transform_indices = @transform_1, window_bounds = array<i64: 16, 256>}, {pipeline_mode = #tpu.pipeline_mode<synchronous>, transform_indices = @transform_2, window_bounds = array<i64: 16, 128>}, {pipeline_mode = #tpu.pipeline_mode<synchronous>, transform_indices = @transform_3, window_bounds = array<i64: 384, 128>}, {pipeline_mode = #tpu.pipeline_mode<synchronous>, transform_indices = @transform_4, window_bounds = array<i64: 128, 256>}, {pipeline_mode = #tpu.pipeline_mode<synchronous>, transform_indices = @transform_5, window_bounds = array<i64: 1, 256>}, {pipeline_mode = #tpu.pipeline_mode<synchronous>, transform_indices = @transform_6, window_bounds = array<i64: 16, 256>}, {pipeline_mode = #tpu.pipeline_mode<synchronous>, transform_indices = @transform_7, window_bounds = array<i64: 16, 256>}]} {
    %c0 = arith.constant 0 : index
    %c0_0 = arith.constant 0 : index
    %0 = vector.load %arg1[%c0, %c0_0] : memref<16x384xbf16, #tpu.memory_space<vmem>>, vector<16x384xbf16>
    %1 = vector.extract_strided_slice %0 {offsets = [0, 0], sizes = [16, 256], strides = [1, 1]} : vector<16x384xbf16> to vector<16x256xbf16>
    %2 = arith.extf %1 : vector<16x256xbf16> to vector<16x256xf32>
    %c0_1 = arith.constant 0 : index
    %c0_2 = arith.constant 0 : index
    %3 = vector.load %arg2[%c0_1, %c0_2] : memref<16x256xf32, #tpu.memory_space<vmem>>, vector<16x256xf32>
    %c0_3 = arith.constant 0 : index
    %c0_4 = arith.constant 0 : index
    %4 = vector.load %arg4[%c0_3, %c0_4] : memref<384x128xbf16, #tpu.memory_space<vmem>>, vector<384x128xbf16>
    %cst = arith.constant dense<0.000000e+00> : vector<16x128xf32>
    %5 = tpu.matmul %0, %4, %cst {dimension_numbers = #tpu.dot_dimension_numbers<[1], [0], [0], [1], [0, 0, 1, 1], [], []>} : vector<16x384xbf16>, vector<384x128xbf16>, vector<16x128xf32> -> vector<16x128xf32>
    %c0_5 = arith.constant 0 : index
    %c0_6 = arith.constant 0 : index
    %6 = vector.load %arg3[%c0_5, %c0_6] : memref<16x128xf32, #tpu.memory_space<vmem>>, vector<16x128xf32>
    %7 = arith.addf %5, %6 : vector<16x128xf32>
    %cst_7 = arith.constant 0.000000e+00 : f32
    %8 = vector.broadcast %cst_7 : f32 to vector<16x128xf32>
    %9 = arith.maximumf %7, %8 : vector<16x128xf32>
    %10 = arith.truncf %9 : vector<16x128xf32> to vector<16x128xbf16>
    %c0_8 = arith.constant 0 : index
    %c0_9 = arith.constant 0 : index
    %11 = vector.load %arg5[%c0_8, %c0_9] : memref<128x256xbf16, #tpu.memory_space<vmem>>, vector<128x256xbf16>
    %cst_10 = arith.constant dense<0.000000e+00> : vector<16x256xf32>
    %12 = tpu.matmul %10, %11, %cst_10 {dimension_numbers = #tpu.dot_dimension_numbers<[1], [0], [0], [1], [0, 0, 1, 1], [], []>} : vector<16x128xbf16>, vector<128x256xbf16>, vector<16x256xf32> -> vector<16x256xf32>
    %c0_11 = arith.constant 0 : index
    %c0_12 = arith.constant 0 : index
    %13 = vector.load %arg6[%c0_11, %c0_12] : memref<1x256xf32, #tpu.memory_space<vmem>>, vector<1x256xf32>
    %14 = vector.broadcast %13 : vector<1x256xf32> to vector<16x256xf32>
    %15 = arith.addf %12, %14 : vector<16x256xf32>
    %cst_13 = arith.constant 1.000000e+00 : f32
    %16 = vector.broadcast %cst_13 : f32 to vector<16x256xf32>
    %17 = arith.subf %16, %2 : vector<16x256xf32>
    %18 = arith.mulf %3, %17 : vector<16x256xf32>
    %cst_14 = arith.constant 1.000000e+00 : f32
    %19 = vector.broadcast %cst_14 : f32 to vector<16x256xf32>
    %20 = arith.subf %19, %3 : vector<16x256xf32>
    %21 = arith.mulf %20, %2 : vector<16x256xf32>
    %22 = arith.addf %18, %21 : vector<16x256xf32>
    %23 = math.absf %15 : vector<16x256xf32>
    %cst_15 = arith.constant 0.000000e+00 : f32
    %24 = vector.broadcast %cst_15 : f32 to vector<16x256xf32>
    %25 = arith.subf %24, %23 : vector<16x256xf32>
    %26 = math.exp %25 : vector<16x256xf32>
    %cst_16 = arith.constant 0.000000e+00 : f32
    %27 = vector.broadcast %cst_16 : f32 to vector<16x256xf32>
    %28 = arith.maximumf %15, %27 : vector<16x256xf32>
    %29 = arith.mulf %15, %22 : vector<16x256xf32>
    %30 = arith.subf %28, %29 : vector<16x256xf32>
    %31 = math.log1p %26 : vector<16x256xf32>
    %32 = arith.addf %30, %31 : vector<16x256xf32>
    %cst_17 = arith.constant 1.000000e+00 : f32
    %33 = vector.broadcast %cst_17 : f32 to vector<16x256xf32>
    %34 = arith.addf %33, %26 : vector<16x256xf32>
    %35 = tpu.reciprocal %34 {approx = true} : vector<16x256xf32> -> vector<16x256xf32>
    %cst_18 = arith.constant 0.000000e+00 : f32
    %36 = vector.broadcast %cst_18 : f32 to vector<16x256xf32>
    %37 = arith.cmpf oge, %15, %36 : vector<16x256xf32>
    %38 = arith.mulf %26, %35 : vector<16x256xf32>
    %39 = arith.select %37, %35, %38 : vector<16x256xi1>, vector<16x256xf32>
    %40 = arith.mulf %39, %22 : vector<16x256xf32>
    %cst_19 = arith.constant 1.000000e+00 : f32
    %41 = vector.broadcast %cst_19 : f32 to vector<16x256xf32>
    %42 = arith.subf %41, %39 : vector<16x256xf32>
    %cst_20 = arith.constant 1.000000e+00 : f32
    %43 = vector.broadcast %cst_20 : f32 to vector<16x256xf32>
    %44 = arith.subf %43, %22 : vector<16x256xf32>
    %45 = arith.mulf %42, %44 : vector<16x256xf32>
    %46 = arith.addf %40, %45 : vector<16x256xf32>
    %cst_21 = arith.constant 1.000000e+00 : f32
    %47 = vector.broadcast %cst_21 : f32 to vector<16x256xf32>
    %48 = arith.subf %47, %46 : vector<16x256xf32>
    %cst_22 = arith.constant 9.99999997E-7 : f32
    %cst_23 = arith.constant 0.999998986 : f32
    %49 = vector.broadcast %cst_22 : f32 to vector<16x256xf32>
    %50 = arith.maximumf %49, %48 : vector<16x256xf32>
    %51 = vector.broadcast %cst_23 : f32 to vector<16x256xf32>
    %52 = arith.minimumf %51, %50 : vector<16x256xf32>
    %53 = arith.mulf %32, %52 : vector<16x256xf32>
    %cst_24 = arith.constant dense<0.000000e+00> : vector<16xf32>
    %54 = vector.multi_reduction <add>, %22, %cst_24 [1] : vector<16x256xf32> to vector<16xf32>
    %55 = vector.shape_cast %54 : vector<16xf32> to vector<16x1xf32>
    %cst_25 = arith.constant 3.906250e-03 : f32
    %56 = vector.broadcast %cst_25 : f32 to vector<16x1xf32>
    %57 = arith.mulf %55, %56 : vector<16x1xf32>
    %cst_26 = arith.constant 1.000000e+00 : f32
    %58 = vector.broadcast %cst_26 : f32 to vector<16x1xf32>
    %59 = arith.subf %58, %57 : vector<16x1xf32>
    %60 = vector.broadcast %59 : vector<16x1xf32> to vector<16x256xf32>
    %61 = arith.mulf %60, %22 : vector<16x256xf32>
    %cst_27 = arith.constant 1.000000e+00 : f32
    %62 = vector.broadcast %cst_27 : f32 to vector<16x256xf32>
    %63 = arith.subf %62, %22 : vector<16x256xf32>
    %64 = vector.broadcast %57 : vector<16x1xf32> to vector<16x256xf32>
    %65 = arith.mulf %64, %63 : vector<16x256xf32>
    %66 = arith.addf %61, %65 : vector<16x256xf32>
    %cst_28 = arith.constant 3.906250e-03 : f32
    %67 = vector.broadcast %cst_28 : f32 to vector<16x256xf32>
    %68 = arith.addf %66, %67 : vector<16x256xf32>
    %69 = arith.mulf %68, %53 : vector<16x256xf32>
    %c0_29 = arith.constant 0 : index
    %c0_30 = arith.constant 0 : index
    %70 = vector.load %arg7[%c0_29, %c0_30] : memref<16x256xf32, #tpu.memory_space<vmem>>, vector<16x256xf32>
    tpu.vector_store %arg7[%c0_29, %c0_30], %69 {strides = array<i32>} : memref<16x256xf32, #tpu.memory_space<vmem>>, vector<16x256xf32>,
    %cst_31 = arith.constant 0.000000e+00 : f32
    %71 = vector.broadcast %cst_31 : f32 to vector<16x256xf32>
    %72 = arith.subf %71, %15 : vector<16x256xf32>
    %73 = arith.mulf %2, %72 : vector<16x256xf32>
    %cst_32 = arith.constant 1.000000e+00 : f32
    %74 = vector.broadcast %cst_32 : f32 to vector<16x256xf32>
    %75 = arith.subf %74, %2 : vector<16x256xf32>
    %76 = arith.mulf %75, %15 : vector<16x256xf32>
    %77 = arith.addf %73, %76 : vector<16x256xf32>
    %cst_33 = arith.constant 0.000000e+00 : f32
    %78 = vector.broadcast %cst_33 : f32 to vector<16x256xf32>
    %79 = arith.cmpf ogt, %77, %78 : vector<16x256xf32>
    %80 = arith.extui %79 : vector<16x256xi1> to vector<16x256xi32>
    %81 = arith.sitofp %80 : vector<16x256xi32> to vector<16x256xf32>
    %82 = arith.cmpf oeq, %81, %3 : vector<16x256xf32>
    %83 = arith.extui %82 : vector<16x256xi1> to vector<16x256xi32>
    %84 = arith.sitofp %83 : vector<16x256xi32> to vector<16x256xf32>
    %c0_34 = arith.constant 0 : index
    %c0_35 = arith.constant 0 : index
    %85 = vector.load %arg8[%c0_34, %c0_35] : memref<16x256xf32, #tpu.memory_space<vmem>>, vector<16x256xf32>
    tpu.vector_store %arg8[%c0_34, %c0_35], %84 {strides = array<i32>} : memref<16x256xf32, #tpu.memory_space<vmem>>, vector<16x256xf32>,
    return
  }
  func.func @transform_0(%arg0: i32) -> (i32, i32) {
    %c0_i32 = arith.constant 0 : i32
    %c0_i32_0 = arith.constant 0 : i32
    %c0_i32_1 = arith.constant 0 : i32
    return %c0_i32, %c0_i32_0 : i32, i32
  }
  func.func @transform_1(%arg0: i32) -> (i32, i32) {
    %c0_i32 = arith.constant 0 : i32
    %c0_i32_0 = arith.constant 0 : i32
    %c0_i32_1 = arith.constant 0 : i32
    return %c0_i32, %c0_i32_0 : i32, i32
  }
  func.func @transform_2(%arg0: i32) -> (i32, i32) {
    %c0_i32 = arith.constant 0 : i32
    %c0_i32_0 = arith.constant 0 : i32
    %c0_i32_1 = arith.constant 0 : i32
    return %c0_i32, %c0_i32_0 : i32, i32
  }
  func.func @transform_3(%arg0: i32) -> (i32, i32) {
    %c0_i32 = arith.constant 0 : i32
    %c0_i32_0 = arith.constant 0 : i32
    %c0_i32_1 = arith.constant 0 : i32
    return %c0_i32, %c0_i32_0 : i32, i32
  }
  func.func @transform_4(%arg0: i32) -> (i32, i32) {
    %c0_i32 = arith.constant 0 : i32
    %c0_i32_0 = arith.constant 0 : i32
    %c0_i32_1 = arith.constant 0 : i32
    return %c0_i32, %c0_i32_0 : i32, i32
  }
  func.func @transform_5(%arg0: i32) -> (i32, i32) {
    %c0_i32 = arith.constant 0 : i32
    %c0_i32_0 = arith.constant 0 : i32
    %c0_i32_1 = arith.constant 0 : i32
    return %c0_i32, %c0_i32_0 : i32, i32
  }
  func.func @transform_6(%arg0: i32) -> (i32, i32) {
    %c0_i32 = arith.constant 0 : i32
    %c0_i32_0 = arith.constant 0 : i32
    %c0_i32_1 = arith.constant 0 : i32
    return %c0_i32, %c0_i32_0 : i32, i32
  }
  func.func @transform_7(%arg0: i32) -> (i32, i32) {
    %c0_i32 = arith.constant 0 : i32
    %c0_i32_0 = arith.constant 0 : i32
    %c0_i32_1 = arith.constant 0 : i32
    return %c0_i32, %c0_i32_0 : i32, i32
  }
}

</mosaic_0001>

<bundles_post_ra>
// kernel: binary_diffusion_forward.1
= control target key start
LH: loop header
LB: loop body
LE: loop exit
PB: predicated region body
PF: predicated region fallthrough
CT: control target
= control target key end

     0   :  { %v894_v1 = vmov 0.0   ;;  %vm895_vm0 = vmmov 0   ;;  %s1340_s3 = inlined_call_operand.vmem [shape: bf16[384,128], index: 3, kind: input, shape index: {}]   ;;  %s1341_s0 = inlined_call_operand.vmem [shape: bf16[16,384], index: 0, kind: input, shape index: {}]   ;;  %s1342_s4 = inlined_call_operand.vmem [shape: bf16[128,256], index: 4, kind: input, shape index: {}]   ;;  %s1343_s1 = inlined_call_operand.vmem [shape: f32[16,256], index: 1, kind: input, shape index: {}]   ;;  %s1344_s2 = inlined_call_operand.vmem [shape: f32[16,128], index: 2, kind: input, shape index: {}]   ;;  %s1345_s5 = inlined_call_operand.vmem [shape: f32[1,256], index: 5, kind: input, shape index: {}]   ;;  %s1346_s7 = inlined_call_operand.vmem [shape: f32[16,256], index: 7, kind: output, shape index: {1}]   ;;  %s1347_s6 = inlined_call_operand.vmem [shape: f32[16,256], index: 6, kind: output, shape index: {0}]  }
   0x1   :  { %v819_v0 = vld [vmem:[%s1340_s3 + $0x40] sm:$0xff]   ;;  %796 = vmatprep.subr.bf16.mxu1 %v894_v1  ;;  %812 = vmatprep.mubr.msk.bf16.mxu1 %vm895_vm0, %v894_v1  ;;  %v822_v4 = vld [vmem:[%s1340_s3 + $0x48] sm:$0xff]   ;;  %v825_v7 = vld [vmem:[%s1340_s3 + $0x50] sm:$0xff]  }
   0x2   :  { %v820_v2 = vld [vmem:[%s1340_s3] sm:$0xff]   ;;  %765 = vmatprep.subr.bf16.mxu0 %v819_v0  ;;  %v823_v5 = vld [vmem:[%s1340_s3 + $0x8] sm:$0xff]   ;;  %v826_v8 = vld [vmem:[%s1340_s3 + $0x10] sm:$0xff]  }
   0x3   :  { %v821_v3 = vld [vmem:[%s1340_s3 + $0x80] sm:$0xff]   ;;  %766 = vmatpush3.bf16.msra.mxu0 %v820_v2  ;;  %v824_v6 = vld [vmem:[%s1340_s3 + $0x88] sm:$0xff]   ;;  %v827_v9 = vld [vmem:[%s1340_s3 + $0x90] sm:$0xff]  }
   0x4   :  { %797 = vmatpush3.bf16.msra.mxu1 %v821_v3  ;;  %767 = vmatprep.subr.bf16.mxu0 %v822_v4  ;;  %v828_v10 = vld [vmem:[%s1340_s3 + $0x58] sm:$0xff]   ;;  %v831_v13 = vld [vmem:[%s1340_s3 + $0x60] sm:$0xff]   ;;  %v834_v16 = vld [vmem:[%s1340_s3 + $0x68] sm:$0xff]  }
   0x5   :  { %798 = vmatprep.subr.bf16.mxu1 %v894_v1  ;;  %v829_v11 = vld [vmem:[%s1340_s3 + $0x18] sm:$0xff]   ;;  %v832_v14 = vld [vmem:[%s1340_s3 + $0x20] sm:$0xff]   ;;  %v835_v17 = vld [vmem:[%s1340_s3 + $0x28] sm:$0xff]  }
   0x6   :  { %v830_v12 = vld [vmem:[%s1340_s3 + $0x98] sm:$0xff]   ;;  %v833_v15 = vld [vmem:[%s1340_s3 + $0xa0] sm:$0xff]   ;;  %v836_v18 = vld [vmem:[%s1340_s3 + $0xa8] sm:$0xff]  }
   0x7   :  { %768 = vmatpush3.bf16.msra.mxu0 %v823_v5  ;;  %v837_v19 = vld [vmem:[%s1340_s3 + $0x70] sm:$0xff]   ;;  %v26_v21 = vld [vmem:[%s1341_s0] sm:$0xff]  ;;  %v840_v24 = vld [vmem:[%s1340_s3 + $0x78] sm:$0xff]   ;;  %v896_v5 = vmov 0  }
   0x8   :  { %799 = vmatpush3.bf16.msra.mxu1 %v824_v6  ;;  %769 = vmatprep.subr.bf16.mxu0 %v825_v7  ;;  %v838_v20 = vld [vmem:[%s1340_s3 + $0x30] sm:$0xff]   ;;  %v841_v26 = vld [vmem:[%s1340_s3 + $0x38] sm:$0xff]   ;;  %v848_v28 = vld [vmem:[%s1342_s4 + $0x4] ss:$8 sps:$4 sm:$0xff]   ;;  %v1093_v50 = vunpack.c.l.bf16 %v26_v21  ;;  %v1095_v51 = vunpack.c.h.bf16 %v26_v21 }
   0x9   :  { %800 = vmatprep.subr.bf16.mxu1 %v894_v1  ;;  %v28_v22 = vld [vmem:[%s1341_s0 + $0xc] sm:$0xff]  ;;  %v843_v27 = vld [vmem:[%s1340_s3 + $0xb8] sm:$0xff]   ;;  %v845_v30 = vld [vmem:[%s1341_s0 + $0x8] ss:$12 sps:$4 sm:$0xff]  }
   0xa   :  { %v839_v23 = vld [vmem:[%s1340_s3 + $0xb0] sm:$0xff]   ;;  %v715_v25 = vcombine.high %v26_v21, %v28_v22  ;;  %v714_v29 = vcombine.low %v26_v21, %v28_v22  ;;  %v846_v31 = vld [vmem:[%s1342_s4] ss:$8 sps:$4 sm:$0xff]   ;;  %v854_v34 = vld [vmem:[%s1342_s4 + $0x24] ss:$8 sps:$4 sm:$0xff]   ;;  %v1068_v43 = vunpack.c.l.bf16 %v28_v22  ;;  %v1070_v44 = vunpack.c.h.bf16 %v28_v22 }
   0xb   :  { %770 = vmatpush3.bf16.msra.mxu0 %v826_v8  ;;  %v851_v32 = vld [vmem:[%s1342_s4 + $0x14] ss:$8 sps:$4 sm:$0xff]   ;;  %v849_v33 = vld [vmem:[%s1342_s4 + $0x10] ss:$8 sps:$4 sm:$0xff]   ;;  %v852_v35 = vld [vmem:[%s1342_s4 + $0x20] ss:$8 sps:$4 sm:$0xff]  }
   0xc   :  { %801 = vmatpush3.bf16.msra.mxu1 %v827_v9  ;;  %771 = vmatprep.subr.bf16.mxu0 %v828_v10  ;;  %v857_v36 = vld [vmem:[%s1342_s4 + $0x34] ss:$8 sps:$4 sm:$0xff]   ;;  %v855_v37 = vld [vmem:[%s1342_s4 + $0x30] ss:$8 sps:$4 sm:$0xff]   ;;  %v860_v38 = vld [vmem:[%s1342_s4 + $0x44] ss:$8 sps:$4 sm:$0xff]  }
   0xd   :  { %802 = vmatprep.subr.bf16.mxu1 %v894_v1  ;;  %280 = vmatprep.mubr.bf16.mxu0 %v715_v25  ;;  %v858_v39 = vld [vmem:[%s1342_s4 + $0x40] ss:$8 sps:$4 sm:$0xff]   ;;  %v863_v40 = vld [vmem:[%s1342_s4 + $0x54] ss:$8 sps:$4 sm:$0xff]   ;;  %v861_v41 = vld [vmem:[%s1342_s4 + $0x50] ss:$8 sps:$4 sm:$0xff]  }
   0xe   :  { %v1066_v42 = vld [vmem:[%s1343_s1] sm:$0xff]  ;;  %v1075_v45 = vld [vmem:[%s1343_s1 + $0x8] sm:$0xff]  ;;  %v1080_v46 = vld [vmem:[%s1343_s1 + $0x10] sm:$0xff]  ;;  %v486_v55 = vsub.f32 1.0, %v1068_v43  ;;  %v487_v56 = vsub.f32 1.0, %v1070_v44  ;;  %v484_v60 = vsub.f32 1.0, %v1093_v50 }
   0xf   :  { %772 = vmatpush3.bf16.msra.mxu0 %v829_v11  ;;  %v866_v47 = vld [vmem:[%s1342_s4 + $0x64] ss:$8 sps:$4 sm:$0xff]   ;;  %v1088_v48 = vld [vmem:[%s1343_s1 + $0x18] sm:$0xff]  ;;  %v864_v49 = vld [vmem:[%s1342_s4 + $0x60] ss:$8 sps:$4 sm:$0xff]   ;;  %v492_v52 = vsub.f32 1.0, %v1066_v42 }
  0x10   :  { %803 = vmatpush3.bf16.msra.mxu1 %v830_v12  ;;  %773 = vmatprep.subr.bf16.mxu0 %v831_v13  ;;  %v493_v53 = vsub.f32 1.0, %v1075_v45  ;;  %v494_v54 = vsub.f32 1.0, %v1080_v46  ;;  %v495_v57 = vsub.f32 1.0, %v1088_v48  ;;  %v869_v58 = vld [vmem:[%s1342_s4 + $0x74] ss:$8 sps:$4 sm:$0xff]   ;;  %v485_v61 = vsub.f32 1.0, %v1095_v51 }
  0x11   :  { %804 = vmatprep.subr.bf16.mxu1 %v894_v1  ;;  %v867_v59 = vld [vmem:[%s1342_s4 + $0x70] ss:$8 sps:$4 sm:$0xff]   ;;  %v496_v62 = vmul.f32 %v492_v52, %v1093_v50  ;;  %v490_v2 = vmul.f32 %v486_v55, %v1080_v46  ;;  %v491_v3 = vmul.f32 %v487_v56, %v1088_v48  ;;  %v488_v6 = vmul.f32 %v484_v60, %v1066_v42  ;;  %v87_v22 = vld [vmem:[%s1344_s2 + $0x8] sm:$0xff] }
  0x12   :  { %v497_v63 = vmul.f32 %v493_v53, %v1095_v51  ;;  %v498_v0 = vmul.f32 %v494_v54, %v1068_v43  ;;  %v499_v4 = vmul.f32 %v495_v57, %v1070_v44  ;;  %v489_v7 = vmul.f32 %v485_v61, %v1075_v45 }
  0x13   :  { %774 = vmatpush3.bf16.msra.mxu0 %v832_v14  ;;  %v1123_v8 = vadd.f32 %v496_v62, %v488_v6 }
  0x14   :  { %805 = vmatpush3.bf16.msra.mxu1 %v833_v15  ;;  %775 = vmatprep.subr.bf16.mxu0 %v834_v16  ;;  %v1125_v9 = vadd.f32 %v497_v63, %v489_v7  ;;  %v1127_v10 = vadd.f32 %v498_v0, %v490_v2  ;;  %v1129_v11 = vadd.f32 %v499_v4, %v491_v3  ;;  %v86_v16 = vld [vmem:[%s1344_s2] sm:$0xff] }
  0x15   :  { %806 = vmatprep.subr.bf16.mxu1 %v894_v1 }
  0x16   :  { %v628_v12 = vadd.f32 %v1125_v9, %v1123_v8  ;;  %v631_v13 = vadd.f32 %v1129_v11, %v1127_v10 }
  0x17   :  { %776 = vmatpush3.bf16.msra.mxu0 %v835_v17 }
  0x18   :  { %807 = vmatpush3.bf16.msra.mxu1 %v836_v18  ;;  %777 = vmatprep.subr.bf16.mxu0 %v837_v19 }
  0x19   :  { %808 = vmatprep.subr.bf16.mxu1 %v894_v1  ;;  %629 = vadd.xlane.f32.xlu0 %v628_v12 }
  0x1b   :  { %778 = vmatpush3.bf16.msra.mxu0 %v838_v20 }
  0x1c   :  { %809 = vmatpush3.bf16.msra.mxu1 %v839_v23  ;;  %779 = vmatprep.subr.bf16.mxu0 %v840_v24 }
  0x1d   :  { %810 = vmatprep.subr.bf16.mxu1 %v894_v1  ;;  %632 = vadd.xlane.f32.xlu0 %v631_v13 }
  0x1f   :  { %780 = vmatpush3.bf16.msra.mxu0 %v841_v26 }
  0x20   :  { %811 = vmatpush3.bf16.msra.mxu1 %v843_v27  ;;  %441 = vmatprep.subr.bf16.mxu0 %v848_v28 }
  0x22   :  { %281 = vmatmul.mubr.bf16.vlgmr.msra.gmra.mrb[0].mxu0 %v714_v29 }
  0x23   :  { %813 = vmatmul.mubr.bf16.vlgmr.msra.gmra.mrb[0].mxu1 %v845_v30  ;;  %442 = vmatpush1.bf16.msra.mxu0 %v846_v31 }
  0x24   :  { %443 = vmatprep.subr.bf16.mxu0 %v851_v32  ;;  %473 = vmatprep.mubr.bf16.mxu0 %v896_v5 }
  0x27   :  { %444 = vmatpush1.bf16.msra.mxu0 %v849_v33  ;;  %v351_v33 = vlaneseq }
  0x28   :  { %445 = vmatprep.subr.bf16.mxu0 %v854_v34 }
  0x29   :  { %v352_v34 = vshrl.u32 %v351_v33, 7  ;;  %v600_v33 = vsub.f32 1.0, %v1123_v8 }
  0x2b   :  { %446 = vmatpush1.bf16.msra.mxu0 %v852_v35  ;;  %v353_v35 = vsub.s32 0, %v352_v34 }
  0x2c   :  { %447 = vmatprep.subr.bf16.mxu0 %v857_v36  ;;  %v349_v36 = vld [vmem:[%s1345_s5] sm:$0x3] }
  0x2f   :  { %448 = vmatpush1.bf16.msra.mxu0 %v855_v37  ;;  %v357_v37 = vsub.s32 1, %v352_v34 }
  0x30   :  { %449 = vmatprep.subr.bf16.mxu0 %v860_v38  ;;  %v354_v38 = vrot.slane %v349_v36, %v353_v35 }
  0x33   :  { %450 = vmatpush1.bf16.msra.mxu0 %v858_v39  ;;  %v358_v39 = vrot.slane %v349_v36, %v357_v37  ;;  %v601_v37 = vsub.f32 1.0, %v1125_v9 }
  0x34   :  { %451 = vmatprep.subr.bf16.mxu0 %v863_v40 }
  0x37   :  { %452 = vmatpush1.bf16.msra.mxu0 %v861_v41 }
  0x38   :  { %453 = vmatprep.subr.bf16.mxu0 %v866_v47 }
  0x3b   :  { %454 = vmatpush1.bf16.msra.mxu0 %v864_v49 }
  0x3c   :  { %455 = vmatprep.subr.bf16.mxu0 %v869_v58 }
  0x3f   :  { %456 = vmatpush1.bf16.msra.mxu0 %v867_v59 }
  0xf5   :  { %v781_v14 = vpop.f32.mrb[0].mxu0 }
  0xf6   :  { %v782_v15 = vpop.f32.mrb[1].mxu0  ;;  %v323_v17 = vpop.f32.mrb[0].mxu1 }
  0xf7   :  { %v783_v18 = vadd.f32 %v782_v15, %v781_v14  ;;  %v784_v19 = vpop.f32.mrb[2].mxu0  ;;  %v814_v20 = vpop.f32.mrb[1].mxu1 }
  0xf8   :  { %v785_v21 = vpop.f32.mrb[3].mxu0  ;;  %v326_v23 = vpop.f32.mrb[2].mxu1 }
  0xf9   :  { %v283_v24 = vadd.f32 %v783_v18, %v86_v16  ;;  %v786_v25 = vadd.f32 %v785_v21, %v784_v19  ;;  %v815_v26 = vpop.f32.mrb[3].mxu1 }
  0xfb   :  { %v324_v27 = vadd.f32 %v323_v17, %v283_v24  ;;  %v286_v28 = vadd.f32 %v786_v25, %v87_v22 }
  0xfd   :  { %v327_v29 = vadd.f32 %v326_v23, %v286_v28  ;;  %v330_v30 = vmax.f32 %v324_v27, 0.0 }
  0xff   :  { %v331_v31 = vmax.f32 %v327_v29, 0.0 }
 0x101   :  { %v332_v32 = vpack.c.bf16 %v331_v31, %v330_v30 }
 0x103   :  { %474 = vmatmul.mubr.bf16.vlgmr.msra.gmra.mrb[4].mxu0 %v332_v32 }
 0x1d6   :  { %v475_v40 = vpop.f32.mrb[4].mxu0 }
 0x1d7   :  { %v1144_v41 = vadd.f32 %v475_v40, %v354_v38  ;;  %v477_v47 = vpop.f32.mrb[5].mxu0 }
 0x1d8   :  { %v1146_v49 = vadd.f32 %v477_v47, %v358_v39  ;;  %v479_v52 = vpop.f32.mrb[6].mxu0 }
 0x1d9   :  { %v504_v53 = vand.u32 2147483647, %v1144_v41  ;;  %v662_v54 = vsub.f32 0.0, %v1144_v41  ;;  %v670_v57 = vmul.f32 %v484_v60, %v1144_v41  ;;  %v1151_v58 = vadd.f32 %v479_v52, %v354_v38  ;;  %v481_v59 = vpop.f32.mrb[7].mxu0 }
 0x1da   :  { %v505_v62 = vand.u32 2147483647, %v1146_v49  ;;  %v663_v63 = vsub.f32 0.0, %v1146_v49  ;;  %v671_v0 = vmul.f32 %v485_v61, %v1146_v49  ;;  %v1156_v2 = vadd.f32 %v481_v59, %v358_v39 }
 0x1db   :  { %v508_v3 = vsub.f32 0.0, %v504_v53  ;;  %v666_v4 = vmul.f32 %v662_v54, %v1093_v50  ;;  %v506_v5 = vand.u32 2147483647, %v1151_v58  ;;  %v664_v6 = vsub.f32 0.0, %v1151_v58 }
 0x1dc   :  { %v509_v7 = vsub.f32 0.0, %v505_v62  ;;  %v667_v60 = vmul.f32 %v663_v63, %v1095_v51  ;;  %v672_v12 = vmul.f32 %v486_v55, %v1151_v58  ;;  %v507_v13 = vand.u32 2147483647, %v1156_v2 }
 0x1dd   :  { %v512_v14 = vmul.f32 1.442695, %v508_v3  ;;  %v674_v61 = vadd.f32 %v670_v57, %v666_v4  ;;  %v510_v15 = vsub.f32 0.0, %v506_v5  ;;  %v668_v16 = vmul.f32 %v664_v6, %v1068_v43  ;;  %v630_v43 = vpop.xlane.xlu0 %629 }
 0x1de   :  { %v514_v17 = vmul.f32 1.442695, %v509_v7  ;;  %v675_v50 = vadd.f32 %v671_v0, %v667_v60  ;;  %v511_v18 = vsub.f32 0.0, %v507_v13  ;;  %v665_v19 = vsub.f32 0.0, %v1156_v2 }
 0x1df   :  { %870 = vpow2.f32 %v512_v14  ;;  %vm678_vm1 = vcmp.gt.f32.partialorder %v674_v61, 0.0  ;;  %v516_v20 = vmul.f32 1.442695, %v510_v15  ;;  %v676_v51 = vadd.f32 %v672_v12, %v668_v16 }
 0x1e0   :  { %v757_v21 = vsel %vm678_vm1, 1.0, %v894_v1  ;;  %872 = vpow2.f32 %v514_v17  ;;  %vm679_vm2 = vcmp.gt.f32.partialorder %v675_v50, 0.0  ;;  %v518_v55 = vmul.f32 1.442695, %v511_v18 }
 0x1e1   :  { %vm690_vm3 = vcmp.eq.f32.partialorder %v757_v21, %v1066_v42  ;;  %v758_v22 = vsel %vm679_vm2, 1.0, %v894_v1  ;;  %874 = vpow2.f32 %v516_v20  ;;  %vm680_vm4 = vcmp.gt.f32.partialorder %v676_v51, 0.0 }
 0x1e2   :  { %v761_v23 = vsel %vm690_vm3, 1.0, %v894_v1  ;;  %vm691_vm5 = vcmp.eq.f32.partialorder %v758_v22, %v1075_v45  ;;  %v759_v24 = vsel %vm680_vm4, 1.0, %v894_v1  ;;  %876 = vpow2.f32 %v518_v55 }
 0x1e3   :  { %702 = vst [vmem:[%s1346_s7] sm:$0xff] %v761_v23  ;;  %v762_v25 = vsel %vm691_vm5, 1.0, %v894_v1  ;;  %vm692_vm6 = vcmp.eq.f32.partialorder %v759_v24, %v1080_v46  ;;  %v669_v42 = vmul.f32 %v665_v19, %v1070_v44  ;;  %v673_v26 = vmul.f32 %v487_v56, %v1156_v2  ;;  %v633_v46 = vpop.xlane.xlu0 %632 }
 0x1e4   :  { %703 = vst [vmem:[%s1346_s7 + $0x8] sm:$0xff] %v762_v25  ;;  %v763_v45 = vsel %vm692_vm6, 1.0, %v894_v1  ;;  %v634_v27 = vmul.f32 0.00390625, %v630_v43  ;;  %v635_v34 = vmul.f32 0.00390625, %v633_v46  ;;  %v602_v57 = vsub.f32 1.0, %v1127_v10 }
 0x1e5   :  { %704 = vst [vmem:[%s1346_s7 + $0x10] sm:$0xff] %v763_v45  ;;  %v677_v28 = vadd.f32 %v673_v26, %v669_v42  ;;  %v603_v62 = vsub.f32 1.0, %v1129_v11  ;;  %v521_v3 = vmax.f32 %v1146_v49, 0.0  ;;  %v525_v4 = vmul.f32 %v1125_v9, %v1146_v49 }
 0x1e6   :  { %v636_v30 = vsub.f32 1.0, %v634_v27  ;;  %v643_v40 = vmul.f32 %v634_v27, %v601_v37  ;;  %v637_v52 = vsub.f32 1.0, %v635_v34  ;;  %v644_v0 = vmul.f32 %v635_v34, %v602_v57 }
 0x1e7   :  { %vm681_vm7 = vcmp.gt.f32.partialorder %v677_v28, 0.0  ;;  %v1230_v60 = vmul.f32 %v635_v34, %v603_v62  ;;  %v520_v12 = vmax.f32 %v1144_v41, 0.0  ;;  %v524_v13 = vmul.f32 %v1123_v8, %v1144_v41 }
 0x1e8   :  { %v760_v29 = vsel %vm681_vm7, 1.0, %v894_v1  ;;  %v638_v38 = vmul.f32 %v636_v30, %v1123_v8  ;;  %v639_v39 = vmul.f32 %v636_v30, %v1125_v9  ;;  %v640_v63 = vmul.f32 %v637_v52, %v1127_v10 }
 0x1e9   :  { %v1191_v31 = vpop.eup %870  ;;  %vm693_vm8 = vcmp.eq.f32.partialorder %v760_v29, %v1088_v48  ;;  %v1238_v61 = vmul.f32 %v637_v52, %v1129_v11  ;;  %vm580_vm9 = vcmp.ge.f32.partialorder %v1144_v41, 0.0  ;;  %vm581_vm10 = vcmp.ge.f32.partialorder %v1146_v49, 0.0 }
 0x1ea   :  { %v1194_v44 = vpop.eup %872  ;;  %v764_v56 = vsel %vm693_vm8, 1.0, %v894_v1  ;;  %v532_v32 = vadd.f32 1.0, %v1191_v31  ;;  %v642_v1 = vmul.f32 %v634_v27, %v600_v33  ;;  %v647_v59 = vadd.f32 %v643_v40, %v639_v39 }
 0x1eb   :  { %v1199_v35 = vpop.eup %874  ;;  %705 = vst [vmem:[%s1346_s7 + $0x18] sm:$0xff] %v764_v56  ;;  %v541_v36 = vadd.f32 1.0, %v1194_v44  ;;  %v535_v5 = vmul.f32 -0.5, %v1191_v31  ;;  %v544_v6 = vmul.f32 -0.5, %v1194_v44  ;;  %v1242_v15 = vadd.f32 %v644_v0, %v640_v63 }
 0x1ec   :  { %v1206_v48 = vpop.eup %876  ;;  %878 = vrcp.f32 %v532_v32  ;;  %v550_v47 = vadd.f32 1.0, %v1199_v35  ;;  %v646_v54 = vadd.f32 %v642_v1, %v638_v38  ;;  %v1235_v14 = vadd.f32 0.00390625, %v647_v59 }
 0x1ed   :  { %880 = vrcp.f32 %v541_v36  ;;  %v559_v53 = vadd.f32 1.0, %v1206_v48  ;;  %v1244_v16 = vsub.f32 %v521_v3, %v525_v4  ;;  %v538_v17 = vand.u32 2147483647, %v1191_v31 }
 0x1ee   :  { %882 = vlog2.f32 %v532_v32  ;;  %v1226_v7 = vadd.f32 0.00390625, %v646_v54  ;;  %v547_v50 = vand.u32 2147483647, %v1194_v44  ;;  %v536_v19 = vadd.f32 1.0, %v535_v5 }
 0x1ef   :  { %884 = vlog2.f32 %v541_v36  ;;  %v545_v20 = vadd.f32 1.0, %v544_v6  ;;  %v522_v51 = vmax.f32 %v1151_v58, 0.0  ;;  %v523_v21 = vmax.f32 %v1156_v2, 0.0 }
 0x1f0   :  { %886 = vrcp.f32 %v550_v47  ;;  %v528_v43 = vsub.f32 %v520_v12, %v524_v13  ;;  %v1253_v23 = vmul.f32 %v1127_v10, %v1151_v58  ;;  %v553_v24 = vmul.f32 -0.5, %v1199_v35 }
 0x1f1   :  { %888 = vrcp.f32 %v559_v53  ;;  %v1259_v26 = vmul.f32 %v1129_v11, %v1156_v2  ;;  %vm582_vm11 = vcmp.ge.f32.partialorder %v1151_v58, 0.0  ;;  %vm583_vm12 = vcmp.ge.f32.partialorder %v1156_v2, 0.0 }
 0x1f2   :  { %890 = vlog2.f32 %v550_v47  ;;  %vm1263_vm13 = vcmp.lt.f32.partialorder %v538_v17, 0.0004427343  ;;  %vm1267_vm14 = vcmp.lt.f32.partialorder %v547_v50, 0.0004427343  ;;  %v556_v29 = vand.u32 2147483647, %v1199_v35 }
 0x1f3   :  { %892 = vlog2.f32 %v559_v53  ;;  %v537_v56 = vmul.f32 %v1191_v31, %v536_v19  ;;  %v546_v32 = vmul.f32 %v1194_v44, %v545_v20  ;;  %v554_v39 = vadd.f32 1.0, %v553_v24 }
 0x1f4   :  { %v562_v40 = vmul.f32 -0.5, %v1206_v48  ;;  %vm1287_vm15 = vcmp.lt.f32.partialorder %v556_v29, 0.0004427343  ;;  %v652_v58 = vadd.f32 0.00390625, %v1242_v15 }
 0x1f5   :  { %v555_v27 = vmul.f32 %v1199_v35, %v554_v39 }
 0x1f6   :  { %v879_v18 = vpop.eup %878  ;;  %v563_v6 = vadd.f32 1.0, %v562_v40 }
 0x1f7   :  { %v881_v55 = vpop.eup %880  ;;  %v584_v22 = vmul.f32 %v879_v18, %v1191_v31 }
 0x1f8   :  { %v883_v25 = vpop.eup %882  ;;  %v585_v42 = vmul.f32 %v881_v55, %v1194_v44 }
 0x1f9   :  { %v885_v45 = vpop.eup %884  ;;  %v588_v46 = vsel %vm580_vm9, %v879_v18, %v584_v22  ;;  %v534_v41 = vmul.f32 0.6931472, %v883_v25 }
 0x1fa   :  { %v887_v30 = vpop.eup %886  ;;  %v589_v34 = vsel %vm581_vm10, %v881_v55, %v585_v42  ;;  %v596_v36 = vsub.f32 1.0, %v588_v46  ;;  %v592_v52 = vmul.f32 %v588_v46, %v1123_v8  ;;  %v543_v0 = vmul.f32 0.6931472, %v885_v45 }
 0x1fb   :  { %v889_v38 = vpop.eup %888  ;;  %v597_v1 = vsub.f32 1.0, %v589_v34  ;;  %v586_v47 = vmul.f32 %v887_v30, %v1199_v35  ;;  %v593_v44 = vmul.f32 %v589_v34, %v1125_v9  ;;  %v565_v9 = vand.u32 2147483647, %v1206_v48 }
 0x1fc   :  { %v604_v53 = vmul.f32 %v600_v33, %v596_v36  ;;  %v587_v31 = vmul.f32 %v889_v38, %v1206_v48  ;;  %v891_v63 = vpop.eup %890  ;;  %v540_v12 = vsel %vm1263_vm13, %v537_v56, %v534_v41  ;;  %v549_v22 = vsel %vm1267_vm14, %v546_v32, %v543_v0 }
 0x1fd   :  { %v605_v49 = vmul.f32 %v601_v37, %v597_v1  ;;  %v590_v59 = vsel %vm582_vm11, %v887_v30, %v586_v47  ;;  %v893_v4 = vpop.eup %892  ;;  %v552_v19 = vmul.f32 0.6931472, %v891_v63  ;;  %vm1307_vm0 = vcmp.lt.f32.partialorder %v565_v9, 0.0004427343 }
 0x1fe   :  { %v608_v3 = vadd.f32 %v604_v53, %v592_v52  ;;  %v591_v8 = vsel %vm583_vm12, %v889_v38, %v587_v31  ;;  %v598_v33 = vsub.f32 1.0, %v590_v59  ;;  %v594_v17 = vmul.f32 %v590_v59, %v1127_v10 }
 0x1ff   :  { %v609_v5 = vadd.f32 %v605_v49, %v593_v44  ;;  %v599_v37 = vsub.f32 1.0, %v591_v8  ;;  %v595_v20 = vmul.f32 %v591_v8, %v1129_v11  ;;  %v561_v25 = vmul.f32 0.6931472, %v893_v4 }
 0x200   :  { %v612_v13 = vsub.f32 1.0, %v608_v3  ;;  %v606_v50 = vmul.f32 %v602_v57, %v598_v33  ;;  %v568_v57 = vadd.f32 %v540_v12, %v528_v43  ;;  %v564_v30 = vmul.f32 %v1206_v48, %v563_v6 }
 0x201   :  { %v613_v18 = vsub.f32 1.0, %v609_v5  ;;  %v607_v55 = vmul.f32 %v603_v62, %v599_v37  ;;  %v569_v62 = vadd.f32 %v549_v22, %v1244_v16  ;;  %v558_v56 = vsel %vm1287_vm15, %v555_v27, %v552_v19 }
 0x202   :  { %v616_v24 = vmax.f32 %v612_v13, 1e-06  ;;  %v610_v42 = vadd.f32 %v606_v50, %v594_v17  ;;  %v530_v35 = vsub.f32 %v522_v51, %v1253_v23  ;;  %v567_v36 = vsel %vm1307_vm0, %v564_v30, %v561_v25 }
 0x203   :  { %v617_v45 = vmax.f32 %v613_v18, 1e-06  ;;  %v611_v10 = vadd.f32 %v607_v55, %v595_v20  ;;  %v531_v48 = vsub.f32 %v523_v21, %v1259_v26  ;;  %v649_v1 = vadd.f32 %v1230_v60, %v1238_v61 }
 0x204   :  { %v620_v29 = vmin.f32 %v616_v24, 0.999999  ;;  %v614_v11 = vsub.f32 1.0, %v610_v42  ;;  %v570_v40 = vadd.f32 %v558_v56, %v530_v35 }
 0x205   :  { %v621_v28 = vmin.f32 %v617_v45, 0.999999  ;;  %v615_v32 = vsub.f32 1.0, %v611_v10  ;;  %v571_v23 = vadd.f32 %v567_v36, %v531_v48  ;;  %v653_v61 = vadd.f32 0.00390625, %v649_v1 }
 0x206   :  { %v624_v34 = vmul.f32 %v620_v29, %v568_v57  ;;  %v618_v43 = vmax.f32 %v614_v11, 1e-06 }
 0x207   :  { %v625_v38 = vmul.f32 %v621_v28, %v569_v62  ;;  %v619_v16 = vmax.f32 %v615_v32, 1e-06 }
 0x208   :  { %v654_v39 = vmul.f32 %v1226_v7, %v624_v34  ;;  %v622_v47 = vmin.f32 %v618_v43, 0.999999 }
 0x209   :  { %v655_v51 = vmul.f32 %v1235_v14, %v625_v38  ;;  %v623_v41 = vmin.f32 %v619_v16, 0.999999 }
 0x20a   :  { %658 = vst [vmem:[%s1347_s6] sm:$0xff] %v654_v39  ;;  %v626_v2 = vmul.f32 %v622_v47, %v570_v40 }
 0x20b   :  { %659 = vst [vmem:[%s1347_s6 + $0x8] sm:$0xff] %v655_v51  ;;  %v627_v60 = vmul.f32 %v623_v41, %v571_v23 }
 0x20c   :  { %v656_v7 = vmul.f32 %v652_v58, %v626_v2 }
 0x20d   :  { %v657_v21 = vmul.f32 %v653_v61, %v627_v60 }
 0x20e   :  { %660 = vst [vmem:[%s1347_s6 + $0x10] sm:$0xff] %v656_v7 }
 0x20f   :  { %661 = vst [vmem:[%s1347_s6 + $0x18] sm:$0xff] %v657_v21 }

</bundles_post_ra>
